<compile_context>
chip_gen: v5e
topology: v5e:2x2
jax: 0.10.0
libtpu: 0.0.40
codegen_flags: <defaults>
</compile_context>

<pallas_src>
import jax
import jax.numpy as jnp
from jax.experimental import pallas as pl
from jax.experimental.pallas import tpu as pltpu


def _round_up(x, m):
    return ((x + m - 1) // m) * m


def _patch_embed_kernel(x_ref, w_ref, b_ref, o_ref):
    # x_ref: (TM, K) bf16 patch tile, w_ref: (K, Ep) bf16, b_ref: (1, Ep) f32,
    # o_ref: (TM, Ep).  f32 accumulation on the MXU, bias added in f32, cast at
    # the final store only.
    acc = jnp.dot(x_ref[...], w_ref[...], preferred_element_type=jnp.float32)
    o_ref[...] = (acc + b_ref[...]).astype(o_ref.dtype)


def patch_embed_3d(x, weight, bias, patch=(1, 16, 16),
                   compute_dtype=jnp.bfloat16, tile_m=512):
    """
    x:      (B, T, C, H, W)
    weight: (E, C, kT, kH, kW)   PyTorch Conv3d weight layout (kT == 1)
    bias:   (E,)
    returns (B, T, E, nH*nW)     (same layout as the PyTorch module)
    """
    B, T, C, H, W = x.shape
    E = weight.shape[0]
    kT, pH, pW = patch
    assert kT == 1 and H % pH == 0 and W % pW == 0
    nH, nW = H // pH, W // pW
    P = nH * nW
    K = C * pH * pW
    M = B * T * P
    out_dtype = x.dtype

    # ---- glue: cast to bf16 first (halves the bytes of the patchify pass),
    # then extract non-overlapping patches flattened in (C, pH, pW) order to
    # match the reshaped Conv3d weight contraction order.
    xc = x.astype(compute_dtype)
    xp = xc.reshape(B, T, C, nH, pH, nW, pW)
    xp = jnp.transpose(xp, (0, 1, 3, 5, 2, 4, 6)).reshape(M, K)

    wm = weight.reshape(E, K).T.astype(compute_dtype)        # (K, E)
    bm = bias.astype(jnp.float32).reshape(1, E)

    # ---- pad E to a lane-dense multiple of 128 (real ViT dims such as 768 are
    # already aligned; this only triggers for small embed dims).
    Ep = max(128, _round_up(E, 128))
    if Ep != E:
        wm = jnp.pad(wm, ((0, 0), (0, Ep - E)))
        bm = jnp.pad(bm, ((0, 0), (0, Ep - E)))

    # ---- M tiling: tiles up to `tile_m` rows for DMA efficiency, but keep at
    # least 2 parallel grid steps (v7x megacore); pad M with zero rows instead
    # of asserting divisibility.
    num_tiles = max(2 if M > 8 else 1, pl.cdiv(M, tile_m))
    TM = _round_up(pl.cdiv(M, num_tiles), 8)
    Mp = TM * num_tiles
    if Mp != M:
        xp = jnp.pad(xp, ((0, Mp - M), (0, 0)))

    out = pl.pallas_call(
        _patch_embed_kernel,
        out_shape=jax.ShapeDtypeStruct((Mp, Ep), out_dtype),
        grid_spec=pltpu.PrefetchScalarGridSpec(
            num_scalar_prefetch=0,
            grid=(num_tiles,),
            in_specs=[
                pl.BlockSpec((TM, K), lambda i: (i, 0)),
                pl.BlockSpec((K, Ep), lambda i: (0, 0)),   # constant block: DMA'd once
                pl.BlockSpec((1, Ep), lambda i: (0, 0)),   # constant block: DMA'd once
            ],
            out_specs=pl.BlockSpec((TM, Ep), lambda i: (i, 0)),
        ),
        compiler_params=pltpu.CompilerParams(
            dimension_semantics=("parallel",)),
    )(xp, wm, bm)

    # ---- glue: drop padding, back to PyTorch output layout (B, T, E, P).
    if Mp != M or Ep != E:
        out = out[:M, :E]
    out = out.reshape(B, T, P, E)
    # TODO(synk): for nH*nW >= 128 the patchify above and this final transpose
    # could be fused into the kernel (raw (B,T,C,H,W) BlockSpec + in-kernel XLU
    # transpose of the (TM,E) tile); kept in XLA so small-P inputs avoid masked
    # lane stores.
    out = jnp.transpose(out, (0, 1, 3, 2))
    return out


def _reference(x, weight, bias, patch, compute_dtype=jnp.bfloat16):
    """Pure-JAX reference using the same bf16 operand rounding, f32 math."""
    B, T, C, H, W = x.shape
    E = weight.shape[0]
    _, pH, pW = patch
    nH, nW = H // pH, W // pW
    K = C * pH * pW
    x32 = x.astype(compute_dtype).astype(jnp.float32)
    w32 = weight.astype(compute_dtype).astype(jnp.float32).reshape(E, K)
    xp = x32.reshape(B, T, C, nH, pH, nW, pW)
    xp = jnp.transpose(xp, (0, 1, 3, 5, 2, 4, 6)).reshape(B, T, nH * nW, K)
    ref = jnp.einsum("btpk,ek->btpe", xp, w32,
                     precision=jax.lax.Precision.HIGHEST)
    ref = ref + bias.astype(jnp.float32)
    return jnp.transpose(ref, (0, 1, 3, 2))


if __name__ == "__main__":
    patch = (1, 16, 16)
    configs = [
        # (B, T, C, H, W, E): small demo, E < 128 exercises the lane-padding path
        (2, 4, 3, 32, 32, 32),
        # E aligned to 128 lanes (no padding path), slightly larger image
        (1, 2, 3, 64, 64, 128),
    ]
    key = jax.random.PRNGKey(0)
    for (B, T, C, H, W, E) in configs:
        key, kx, kw, kb = jax.random.split(key, 4)
        fan_in = C * patch[0] * patch[1] * patch[2]
        x = jax.random.normal(kx, (B, T, C, H, W), dtype=jnp.float32)
        weight = jax.random.normal(kw, (E, C, *patch), dtype=jnp.float32) / jnp.sqrt(fan_in)
        bias = jax.random.normal(kb, (E,), dtype=jnp.float32) * 0.01

        out = jax.block_until_ready(patch_embed_3d(x, weight, bias, patch=patch))

        nH, nW = H // patch[1], W // patch[2]
        assert out.shape == (B, T, E, nH * nW), out.shape
        ref = _reference(x, weight, bias, patch)
        max_err = float(jnp.max(jnp.abs(out - ref)))
        assert jnp.allclose(out, ref, atol=2e-3, rtol=2e-3), max_err

    print("KERNEL_OK")
</pallas_src>

<mosaic_0001>
module attributes {stable_mosaic.version = 11 : i64} {
  func.func @_patch_embed_kernel(%arg0: i32, %arg1: memref<16x768xbf16, #tpu.memory_space<vmem>>, %arg2: memref<768x128xbf16, #tpu.memory_space<vmem>>, %arg3: memref<1x128xf32, #tpu.memory_space<vmem>>, %arg4: memref<16x128xf32, #tpu.memory_space<vmem>>) attributes {dimension_semantics = [#tpu.dimension_semantics<parallel>], iteration_bounds = array<i64: 2>, scalar_prefetch = 0 : i64, scratch_operands = 0 : i64, tpu.core_type = #tpu.core_type<tc>, window_params = [{transform_indices = @transform_0, window_bounds = array<i64: 16, 768>}, {pipeline_mode = #tpu.pipeline_mode<synchronous>, transform_indices = @transform_1, window_bounds = array<i64: 768, 128>}, {pipeline_mode = #tpu.pipeline_mode<synchronous>, transform_indices = @transform_2, window_bounds = array<i64: 1, 128>}, {transform_indices = @transform_3, window_bounds = array<i64: 16, 128>}]} {
    %c0 = arith.constant 0 : index
    %c0_0 = arith.constant 0 : index
    %0 = vector.load %arg1[%c0, %c0_0] : memref<16x768xbf16, #tpu.memory_space<vmem>>, vector<16x768xbf16>
    %c0_1 = arith.constant 0 : index
    %c0_2 = arith.constant 0 : index
    %1 = vector.load %arg2[%c0_1, %c0_2] : memref<768x128xbf16, #tpu.memory_space<vmem>>, vector<768x128xbf16>
    %cst = arith.constant dense<0.000000e+00> : vector<16x128xf32>
    %2 = tpu.matmul %0, %1, %cst {dimension_numbers = #tpu.dot_dimension_numbers<[1], [0], [0], [1], [0, 0, 1, 1], [], []>} : vector<16x768xbf16>, vector<768x128xbf16>, vector<16x128xf32> -> vector<16x128xf32>
    %c0_3 = arith.constant 0 : index
    %c0_4 = arith.constant 0 : index
    %3 = vector.load %arg3[%c0_3, %c0_4] : memref<1x128xf32, #tpu.memory_space<vmem>>, vector<1x128xf32>
    %4 = vector.broadcast %3 : vector<1x128xf32> to vector<16x128xf32>
    %5 = arith.addf %2, %4 : vector<16x128xf32>
    %c0_5 = arith.constant 0 : index
    %c0_6 = arith.constant 0 : index
    %6 = vector.load %arg4[%c0_5, %c0_6] : memref<16x128xf32, #tpu.memory_space<vmem>>, vector<16x128xf32>
    tpu.vector_store %arg4[%c0_5, %c0_6], %5 {strides = array<i32>} : memref<16x128xf32, #tpu.memory_space<vmem>>, vector<16x128xf32>,
    return
  }
  func.func @transform_0(%arg0: i32) -> (i32, i32) {
    %c0_i32 = arith.constant 0 : i32
    %c0_i32_0 = arith.constant 0 : i32
    return %arg0, %c0_i32 : i32, i32
  }
  func.func @transform_1(%arg0: i32) -> (i32, i32) {
    %c0_i32 = arith.constant 0 : i32
    %c0_i32_0 = arith.constant 0 : i32
    %c0_i32_1 = arith.constant 0 : i32
    return %c0_i32, %c0_i32_0 : i32, i32
  }
  func.func @transform_2(%arg0: i32) -> (i32, i32) {
    %c0_i32 = arith.constant 0 : i32
    %c0_i32_0 = arith.constant 0 : i32
    %c0_i32_1 = arith.constant 0 : i32
    return %c0_i32, %c0_i32_0 : i32, i32
  }
  func.func @transform_3(%arg0: i32) -> (i32, i32) {
    %c0_i32 = arith.constant 0 : i32
    %c0_i32_0 = arith.constant 0 : i32
    return %arg0, %c0_i32 : i32, i32
  }
}

</mosaic_0001>

<bundles_post_ra>
// kernel: tpu_custom_call.1
= control target key start
LH: loop header
LB: loop body
LE: loop exit
PB: predicated region body
PF: predicated region fallthrough
CT: control target
= control target key end

     0   :  { %8 = vsyncpa [#allocation3], 0  ;;  %s1488_s0 = inlined_call_operand.hbm [shape: bf16[32,768], index: 0, kind: input, shape index: {}]   ;;  %s1489_s1 = inlined_call_operand.hbm [shape: bf16[768,128], index: 1, kind: input, shape index: {}]   ;;  %s1490_s2 = inlined_call_operand.vmem [shape: f32[1,128], index: 2, kind: input, shape index: {}]   ;;  %s1491_s3 = inlined_call_operand.hbm [shape: f32[32,128], index: 3, kind: output, shape index: {}]  }
   0x1   :  { %10 = vsyncpa [#allocation3 + $0x1], 0 }
   0x2   :  { %11 = vsyncpa [#allocation6], 0 }
   0x3   :  { %12 = vsyncpa [#allocation4], 0 }
   0x4   :  { %14 = vsyncpa [#allocation4 + $0x1], 0  ;;  %s1332_s12 = smov 0   ;;  %s1334_s13 = smov 0  }
   0x5   :  { %s1336_s14 = smov 0   ;;  %s1338_s15 = smov 0  }
   0x6 LB: > { %s1353_s16 = sadd.s32 4294967295, %s1303_s15   ;;  %s820_s17 = sadd.s32 4294967294, %s1303_s15   ;;  %s1303_s15 = sphi %s1338_s15, %s1501_s15   ;;  %s1299_s14 = sphi %s1336_s14, %s1500_s14   ;;  %s1295_s13 = sphi %s1334_s13, %s1499_s13   ;;  %s1291_s12 = sphi %s1332_s12, %s1498_s12  }
   0x7   : > { %p40_p0 = scmp.ne.s32.totalorder %s1295_s13, %s1291_s12  ;;  %p41_p1 = scmp.eq.s32.totalorder %s1353_s16, 0 }
   0x8   : > { %p106_p2 = scmp.eq.s32.totalorder %s1353_s16, 1  ;;  %p112_p3 = scmp.eq.s32.totalorder %s820_s17, 1 }
   0x9   : > { %p1362_p4 = por %p41_p1, %p40_p0  ;;  %p821_p5 = scmp.ge.s32.totalorder %s1303_s15, 1 }
   0xa   : > { %p1367_p6 = por %p112_p3, %p40_p0  ;;  %p119_p7 = scmp.lt.s32.totalorder %s1303_s15, 3 }
   0xb   : > { %s130_s22 = sshll.u32 %s1489_s1, 4  ;;  %s1305_s24 = smov [#allocation5]   ;;  %s131_s22 = int_to_ptr.hbm [resolvable:$true] %s130_s22 }
   0xc   : > { %p1375_p8 = pnand %p821_p5, %p119_p7  ;;  %s132_s25 = sshll.u32 %s1305_s24, 4  ;;  %s133_s25 = int_to_ptr.vmem [resolvable:$true] %s132_s25 }
   0xd   : > { %s1385_s26 = sadd.s32 1, %s1303_s15   ;;  %s1306_s27 = smov 64  }
   0xe   : > { %p1117_p9 = pneg %p1375_p8  ;;  %s1307_s28 = smov 4  }
   0xf   : > { %s24_s29 = ssub.s32 %s1303_s15, %s1385_s26  ;;  %s27_s30 = sadd.s32 1, %s1299_s14 }
  0x10   : > { %p1118_p10 = pnand %p1117_p9, %p41_p1  ;;  %p25_p12 = scmp.eq.s32.totalorder %s24_s29, 0 }
  0x11   : > { %p34_p13 = scmp.ne.s32.totalorder %s1299_s14, %s1295_s13  ;;  %p35_p0 = scmp.eq.s32.totalorder %s1303_s15, 0 }
  0x12   : > { %1120 = dma.hbm_to_vmem [thread:$0]  (!%p1118_p10), %s131_s22, 6144, %s133_s25, [#allocation6], %s1306_s27, %s1306_s27, %s1307_s28  }
  0x13   : > { %p1130_p3 = scmp.lt.s32.totalorder %s1303_s15, 2  ;;  %p36_p5 = por %p35_p0, %p34_p13 }
  0x14   : > { %s1395_s4 = scalar_select %p25_p12, %s1299_s14, %s27_s30  }
  0x15   : > { %p1399_p7 = por %p106_p2, %p34_p13  ;;  %s149_s6 = sand.u32 1, %s1299_s14  }
  0x16   : > { %s1107_s7 = smul.u32 48, %s1303_s15  ;;  %p1408_p9 = pnand %p1130_p3, %p36_p5 }
  0x17   : > { %s1106_s8 = smul.u32 48, %s149_s6  ;;  %s150_s24 = scalar_lea.sflag [#allocation3], %s149_s6 }
  0x18   : > { %s159_s11 = scalar_lea.hbm %s1488_s0, %s1107_s7  ;;  %p1207_p10 = pneg %p1408_p9 }
  0x19   : > { %s160_s20 = sshll.u32 %s159_s11, 4  ;;  %s153_s21 = scalar_lea.vmem [#allocation2], %s1106_s8  ;;  %s161_s20 = int_to_ptr.hbm [resolvable:$true] %s160_s20 }
  0x1a   : > { %s162_s22 = sshll.u32 %s153_s21, 4  ;;  %s1203_s25 = sshra.s32 %s161_s20, 4  ;;  %s163_s22 = int_to_ptr.vmem [resolvable:$true] %s162_s22  ;;  %s1204_s25 = int_to_ptr.hbm [resolvable:$true] %s1203_s25 }
  0x1b   : > { %s1205_s27 = scalar_lea.hbm %s1204_s25, 48  ;;  %s1210_s30 = scalar_lea.hbm %s1488_s0, 96 }
  0x1c   : > { %p1206_p2 = scmp.ne.s32.totalorder %s1204_s25, %s1205_s27  ;;  %p1211_p0 = scmp.lt.s32.totalorder %s1204_s25, %s1488_s0 }
  0x1d   : > { %p1212_p3 = scmp.lt.s32.totalorder %s1210_s30, %s1205_s27 }
  0x1e   : > { %p1208_p12 = pnand %p1207_p10, %p1206_p2 }
  0x1f   : > { %p1213_p5 = por %p1212_p3, %p1211_p0 }
  0x20   : > { %p1209_p13 = pneg %p1208_p12 }
  0x22   : > { %p1214_p11 = pnand %p1213_p5, %p1209_p13 }
  0x24   : > { %1217 = shalt.err (!%p1214_p11)
}
  0x25   : > { %s1308_s6 = smov 384   ;;  %s1309_s8 = smov 24  }
  0x26   : > { %1124 = dma.hbm_to_vmem [thread:$0]  (!%p1408_p9), %s161_s20, 768, %s163_s22, %s150_s24, %s1308_s6, %s1308_s6, %s1309_s8  }
  0x27   : > { %174 = sbr.rel (%p1375_p8) target bundleno = 253 (0xfd), region = 32  ;;  %s1425_s10 = sand.u32 (!%p1375_p8), 1, %s1295_s13  }
  0x28   : > { %s1108_s11 = smul.u32 (!%p1375_p8), 48, %s1425_s10  ;;  %s177_s21 = scalar_lea.sflag (!%p1375_p8), [#allocation3], %s1425_s10 }
  0x2a   : > { %s1429_s25 = scalar_lea.vmem (!%p1375_p8), [#allocation2], %s1108_s11 }
  0x2c   : > { %1278 = dma.done.wait (%p1362_p4), %s177_s21, 768  }
  0x2d   : > { %1280 = vsyncadd (%p1362_p4), %s177_s21, 4294966528 }
  0x2e   : > { %1282 = dma.done.wait (%p41_p1), [#allocation6], 6144  }
  0x2f   : > { %1284 = vsyncadd (%p41_p1), [#allocation6], 4294961152  ;;  %v1064_v0 = vld [vmem:[#allocation5 + $0x38] sm:$0xff]  ;;  %v1063_v4 = vld [vmem:[#allocation5 + $0x30] sm:$0xff]  ;;  %s829_s17 = sshll.u32 %s1425_s10, 4  ;;  %s1105_s20 = sshll.u32 %s1353_s16, 4 }
  0x30   : > { %v1072_v1 = vld [vmem:[#allocation5 + $0x78] sm:$0xff]  ;;  %635 = vmatpush.bf16.msra.mxu0 %v1064_v0  ;;  %v1071_v5 = vld [vmem:[#allocation5 + $0x70] sm:$0xff]  ;;  %v1062_v8 = vld [vmem:[#allocation5 + $0x28] sm:$0xff]  ;;  %s733_s27 = scalar_lea.hbm %s1491_s3, %s1105_s20  ;;  %s208_s28 = scalar_lea.vmem [#allocation7], %s829_s17 }
  0x31   : > { %v1080_v2 = vld [vmem:[#allocation5 + $0xb8] sm:$0xff]  ;;  %649 = vmatpush.bf16.msra.mxu1 %v1072_v1  ;;  %v1079_v6 = vld [vmem:[#allocation5 + $0xb0] sm:$0xff]  ;;  %v1070_v9 = vld [vmem:[#allocation5 + $0x68] sm:$0xff]  ;;  %s734_s29 = sshll.u32 %s208_s28, 4  ;;  %s736_s30 = sshll.u32 %s733_s27, 4  ;;  %s735_s29 = int_to_ptr.vmem [resolvable:$true] %s734_s29  ;;  %s737_s30 = int_to_ptr.hbm [resolvable:$true] %s736_s30 }
  0x32   : > { %v1088_v3 = vld [vmem:[#allocation5 + $0xf8] sm:$0xff]  ;;  %663 = vmatpush.bf16.msra.mxu2 %v1080_v2  ;;  %v1087_v7 = vld [vmem:[#allocation5 + $0xf0] sm:$0xff]  ;;  %v1078_v10 = vld [vmem:[#allocation5 + $0xa8] sm:$0xff]  ;;  %s722_s16 = scalar_lea.sflag [#allocation4], %s1425_s10  ;;  %s1247_s7 = sshra.s32 %s737_s30, 4  ;;  %s1248_s7 = int_to_ptr.hbm [resolvable:$true] %s1247_s7 }
  0x33   : > { %677 = vmatpush.bf16.msra.mxu3 %v1088_v3  ;;  %v1086_v11 = vld [vmem:[#allocation5 + $0xe8] sm:$0xff]  ;;  %v1061_v12 = vld [vmem:[#allocation5 + $0x20] sm:$0xff]  ;;  %v1060_v16 = vld [vmem:[#allocation5 + $0x18] sm:$0xff]  ;;  %s1249_s9 = scalar_lea.hbm %s1248_s7, 16  ;;  %s1253_s11 = scalar_lea.hbm %s1491_s3, 32 }
  0x34   : > { %636 = vmatpush.bf16.msra.mxu0 %v1063_v4  ;;  %v1069_v13 = vld [vmem:[#allocation5 + $0x60] sm:$0xff]  ;;  %v1068_v17 = vld [vmem:[#allocation5 + $0x58] sm:$0xff]  ;;  %v1059_v20 = vld [vmem:[#allocation5 + $0x10] sm:$0xff]  ;;  %p1250_p1 = scmp.ne.s32.totalorder %s1248_s7, %s1249_s9  ;;  %p1254_p11 = scmp.lt.s32.totalorder %s1248_s7, %s1491_s3 }
  0x35   : > { %650 = vmatpush.bf16.msra.mxu1 %v1071_v5  ;;  %v1077_v14 = vld [vmem:[#allocation5 + $0xa0] sm:$0xff]  ;;  %v1076_v18 = vld [vmem:[#allocation5 + $0x98] sm:$0xff]  ;;  %v1067_v21 = vld [vmem:[#allocation5 + $0x50] sm:$0xff]  ;;  %p1255_p9 = scmp.lt.s32.totalorder %s1253_s11, %s1249_s9 }
  0x36   : > { %664 = vmatpush.bf16.msra.mxu2 %v1079_v6  ;;  %v1085_v15 = vld [vmem:[#allocation5 + $0xe0] sm:$0xff]  ;;  %v1084_v19 = vld [vmem:[#allocation5 + $0xd8] sm:$0xff]  ;;  %v1075_v22 = vld [vmem:[#allocation5 + $0x90] sm:$0xff]  ;;  %p1251_p4 = pnand %p1250_p1, %p1399_p7 }
  0x37   : > { %678 = vmatpush.bf16.msra.mxu3 %v1087_v7  ;;  %v1083_v23 = vld [vmem:[#allocation5 + $0xd0] sm:$0xff]  ;;  %v1058_v24 = vld [vmem:[#allocation5 + $0x8] sm:$0xff]  ;;  %v1057_v28 = vld [vmem:[#allocation5] sm:$0xff]  ;;  %p1256_p2 = por %p1255_p9, %p1254_p11 }
  0x38   : > { %637 = vmatpush.bf16.msra.mxu0 %v1062_v8  ;;  %v1066_v25 = vld [vmem:[#allocation5 + $0x48] sm:$0xff]  ;;  %v1065_v29 = vld [vmem:[#allocation5 + $0x40] sm:$0xff]  ;;  %v1096_v34 = vld [vmem:[#allocation5 + $0x138] sm:$0xff]  ;;  %p1252_p8 = pneg %p1251_p4 }
  0x39   : > { %651 = vmatpush.bf16.msra.mxu1 %v1070_v9  ;;  %v1074_v26 = vld [vmem:[#allocation5 + $0x88] sm:$0xff]  ;;  %v832_v30 = vld [vmem:[%s1429_s25] sm:$0xf]  ;;  %v1051_v32 = vld [vmem:[%s1429_s25 + $0x4] sm:$0xf] }
  0x3a   : > { %665 = vmatpush.bf16.msra.mxu2 %v1078_v10  ;;  %v1082_v27 = vld [vmem:[#allocation5 + $0xc8] sm:$0xff]  ;;  %v1104_v35 = vld [vmem:[#allocation5 + $0x178] sm:$0xff]  ;;  %v1073_v36 = vld [vmem:[#allocation5 + $0x80] sm:$0xff]  ;;  %p1257_p10 = pnand %p1256_p2, %p1252_p8 }
  0x3b   : > { %679 = vmatpush.bf16.msra.mxu3 %v1086_v11  ;;  %v1054_v31 = vld [vmem:[%s1429_s25 + $0x14] sm:$0xf0]  ;;  %v834_v33 = vld [vmem:[%s1429_s25 + $0x18] sm:$0xf0]  ;;  %v1081_v37 = vld [vmem:[#allocation5 + $0xc0] sm:$0xff] }
  0x3c   : > { %638 = vmatpush.bf16.msra.mxu0 %v1061_v12  ;;  %v840_v38 = vld [vmem:[%s1429_s25 + $0x8] sm:$0xf]  ;;  %v1055_v39 = vld [vmem:[%s1429_s25 + $0x1c] sm:$0xf0]  ;;  %v833_v40 = vor.u32 %v1054_v31, %v832_v30  ;;  %v1052_v41 = vld [vmem:[%s1429_s25 + $0xc] sm:$0xf]  ;;  %v837_v43 = vor.u32 %v1051_v32, %v834_v33 }
  0x3d   : > { %652 = vmatpush.bf16.msra.mxu1 %v1069_v13  ;;  %v842_v42 = vld [vmem:[%s1429_s25 + $0x20] sm:$0xf0]  ;;  %v841_v46 = vor.u32 %v1055_v39, %v840_v38  ;;  %v1094_v48 = vld [vmem:[#allocation5 + $0x128] sm:$0xff]  ;;  %v1092_v52 = vld [vmem:[#allocation5 + $0x118] sm:$0xff] }
  0x3e   : > { %666 = vmatpush.bf16.msra.mxu2 %v1077_v14  ;;  %v1095_v44 = vld [vmem:[#allocation5 + $0x130] sm:$0xff]  ;;  %v845_v47 = vor.u32 %v1052_v41, %v842_v42  ;;  %v1102_v49 = vld [vmem:[#allocation5 + $0x168] sm:$0xff]  ;;  %v1093_v50 = vld [vmem:[#allocation5 + $0x120] sm:$0xff] }
  0x3f   : > { %680 = vmatpush.bf16.msra.mxu3 %v1085_v15  ;;  %v1103_v45 = vld [vmem:[#allocation5 + $0x170] sm:$0xff]  ;;  %v1101_v51 = vld [vmem:[#allocation5 + $0x160] sm:$0xff]  ;;  %v1100_v53 = vld [vmem:[#allocation5 + $0x158] sm:$0xff] }
  0x40   : > { %639 = vmatpush.bf16.msra.mxu0 %v1060_v16  ;;  %v1091_v54 = vld [vmem:[#allocation5 + $0x110] sm:$0xff]  ;;  %v1090_v56 = vld [vmem:[#allocation5 + $0x108] sm:$0xff]  ;;  %v1089_v58 = vld [vmem:[#allocation5 + $0x100] sm:$0xff] }
  0x41   : > { %653 = vmatpush.bf16.msra.mxu1 %v1068_v17  ;;  %v1099_v55 = vld [vmem:[#allocation5 + $0x150] sm:$0xff]  ;;  %v1098_v57 = vld [vmem:[#allocation5 + $0x148] sm:$0xff]  ;;  %v1097_v59 = vld [vmem:[#allocation5 + $0x140] sm:$0xff] }
  0x42   : > { %667 = vmatpush.bf16.msra.mxu2 %v1076_v18  ;;  %v848_v60 = vld [vmem:[%s1429_s25 + $0x10] sm:$0xf]  ;;  %v1056_v61 = vld [vmem:[%s1429_s25 + $0x24] sm:$0xf0]  ;;  %v1053_v62 = vld [vmem:[%s1429_s25 + $0x14] sm:$0xf] }
  0x43   : > { %681 = vmatpush.bf16.msra.mxu3 %v1084_v19  ;;  %v850_v63 = vld [vmem:[%s1429_s25 + $0x28] sm:$0xf0]  ;;  %v849_v0 = vor.u32 %v1056_v61, %v848_v60  ;;  %v1172_v4 = vld [vmem:[%s1490_s2] ss:$0 sm:$0xff] }
  0x44   : > { %640 = vmatpush.bf16.msra.mxu0 %v1059_v20  ;;  %v853_v1 = vor.u32 %v1053_v62, %v850_v63 }
  0x45   : > { %654 = vmatpush.bf16.msra.mxu1 %v1067_v21 }
  0x46   : > { %668 = vmatpush.bf16.msra.mxu2 %v1075_v22 }
  0x47   : > { %682 = vmatpush.bf16.msra.mxu3 %v1083_v23 }
  0x48   : > { %641 = vmatpush.bf16.msra.mxu0 %v1058_v24 }
  0x49   : > { %655 = vmatpush.bf16.msra.mxu1 %v1066_v25 }
  0x4a   : > { %669 = vmatpush.bf16.msra.mxu2 %v1074_v26 }
  0x4b   : > { %683 = vmatpush.bf16.msra.mxu3 %v1082_v27 }
  0x4c   : > { %642 = vmatpush.bf16.msra.mxu0 %v1057_v28 }
  0x4d   : > { %656 = vmatpush.bf16.msra.mxu1 %v1065_v29 }
  0x4e   : > { %670 = vmatpush.bf16.msra.mxu2 %v1073_v36 }
  0x4f   : > { %684 = vmatpush.bf16.msra.mxu3 %v1081_v37  ;;  %643 = vmatmul.bf16.vlgmr.msra.gmra.mxu0 %v833_v40 }
  0x50   : > { %691 = vmatpush.bf16.msrb.mxu0 %v1096_v34  ;;  %657 = vmatmul.bf16.vlgmr.msra.gmra.mxu1 %v837_v43 }
  0x51   : > { %705 = vmatpush.bf16.msrb.mxu1 %v1104_v35  ;;  %671 = vmatmul.bf16.vlgmr.msra.gmra.mxu2 %v841_v46 }
  0x52   : > { %685 = vmatmul.bf16.vlgmr.msra.gmra.mxu3 %v845_v47 }
  0x54   : > { %692 = vmatpush.bf16.msrb.mxu0 %v1095_v44 }
  0x55   : > { %706 = vmatpush.bf16.msrb.mxu1 %v1103_v45 }
  0x58   : > { %693 = vmatpush.bf16.msrb.mxu0 %v1094_v48 }
  0x59   : > { %707 = vmatpush.bf16.msrb.mxu1 %v1102_v49 }
  0x5c   : > { %694 = vmatpush.bf16.msrb.mxu0 %v1093_v50 }
  0x5d   : > { %708 = vmatpush.bf16.msrb.mxu1 %v1101_v51 }
  0x60   : > { %695 = vmatpush.bf16.msrb.mxu0 %v1092_v52 }
  0x61   : > { %709 = vmatpush.bf16.msrb.mxu1 %v1100_v53 }
  0x64   : > { %696 = vmatpush.bf16.msrb.mxu0 %v1091_v54 }
  0x65   : > { %710 = vmatpush.bf16.msrb.mxu1 %v1099_v55 }
  0x68   : > { %697 = vmatpush.bf16.msrb.mxu0 %v1090_v56 }
  0x69   : > { %711 = vmatpush.bf16.msrb.mxu1 %v1098_v57 }
  0x6c   : > { %698 = vmatpush.bf16.msrb.mxu0 %v1089_v58 }
  0x6d   : > { %712 = vmatpush.bf16.msrb.mxu1 %v1097_v59 }
  0x6f   : > { %699 = vmatmul.bf16.vlgmr.msrb.gmra.mxu0 %v849_v0 }
  0x70   : > { %713 = vmatmul.bf16.vlgmr.msrb.gmra.mxu1 %v853_v1 }
  0xcc   : > { %v644_v2 = vpop.f32.mrf.mxu0 }
  0xcd   : > { %v658_v3 = vpop.f32.mrf.mxu1  ;;  %v645_v5 = vadd.f32 %v1172_v4, %v644_v2 }
  0xcf   : > { %v659_v7 = vadd.f32 %v658_v3, %v645_v5 }
  0xd4   : > { %v672_v6 = vpop.f32.mrf.mxu2  ;;  %v646_v8 = vpop.f32.mrf.mxu0 }
  0xd5   : > { %v660_v9 = vpop.f32.mrf.mxu1  ;;  %v686_v10 = vpop.f32.mrf.mxu3  ;;  %v673_v11 = vadd.f32 %v672_v6, %v659_v7  ;;  %v647_v12 = vadd.f32 %v1172_v4, %v646_v8 }
  0xd7   : > { %v687_v13 = vadd.f32 %v686_v10, %v673_v11  ;;  %v661_v14 = vadd.f32 %v660_v9, %v647_v12 }
  0xdc   : > { %v674_v15 = vpop.f32.mrf.mxu2 }
  0xdd   : > { %v675_v19 = vadd.f32 %v674_v15, %v661_v14  ;;  %v688_v21 = vpop.f32.mrf.mxu3 }
  0xdf   : > { %v689_v22 = vadd.f32 %v688_v21, %v675_v19 }
  0xec   : > { %v700_v16 = vpop.f32.mrf.mxu0 }
  0xed   : > { %v714_v17 = vpop.f32.mrf.mxu1  ;;  %v701_v18 = vadd.f32 %v700_v16, %v687_v13 }
  0xef   : > { %v715_v20 = vadd.f32 %v714_v17, %v701_v18 }
  0xf1   : > { %719 = vst [vmem:[%s208_s28] sm:$0xff] %v715_v20 }
  0xf4   : > { %v702_v23 = vpop.f32.mrf.mxu0 }
  0xf5   : > { %v703_v24 = vadd.f32 %v702_v23, %v689_v22  ;;  %v716_v25 = vpop.f32.mrf.mxu1 }
  0xf7   : > { %v717_v26 = vadd.f32 %v716_v25, %v703_v24 }
  0xf9   : > { %720 = vst [vmem:[%s208_s28 + $0x8] sm:$0xff] %v717_v26 }
  0xfa   : > { %1260 = shalt.err (!%p1257_p10)
}
  0xfb   : > { %s1310_s10 = smov 128   ;;  %s1311_s18 = smov 8  }
  0xfc   : > { %1115 = dma.vmem_to_hbm [thread:$0]  (%p1399_p7), %s735_s29, 256, %s737_s30, %s722_s16, %s1310_s10, %s1310_s10, %s1311_s18  }
  0xfd PF: > { %s751_s23 = sand.u32 1, %s1291_s12   ;;  %p1497_p12 = scmp.ge.s32.totalorder %s1303_s15, 2 }
  0xfe   : > { %s752_s17 = scalar_lea.sflag [#allocation4], %s751_s23 }
  0xff   : > { %p1126_p13 = pnand %p1497_p12, %p1367_p6 }
 0x101   : > { %p1127_p0 = pneg %p1126_p13 }
 0x103   : > { %1286 = dma.done.wait (%p1127_p0), %s752_s17, 256  }
 0x104   : > { %1288 = vsyncadd (%p1127_p0), %s752_s17, 4294967040  ;;  %p17_p3 = scmp.ge.s32.totalorder %s1385_s26, 4   ;;  %s1498_s12 = smov %s1295_s13 }
 0x105   : > { %s1499_s13 = smov %s1299_s14  ;;  %s1500_s14 = smov %s1395_s4 }
 0x106   : > { %s1501_s15 = smov %s1385_s26  ;;  %19 = sbr.rel (!%p17_p3) target bundleno = 6 (0x6), region = 81 }
 0x10b   :  { %758 = vsyncpa [#allocation3], 1 }
 0x10c   :  { %760 = vsyncpa [#allocation3 + $0x1], 1 }
 0x10d   :  { %761 = vsyncpa [#allocation6], 1 }
 0x10e   :  { %762 = vsyncpa [#allocation4], 1 }
 0x10f   :  { %764 = vsyncpa [#allocation4 + $0x1], 1 }

</bundles_post_ra>
